<compile_context>
chip_gen: v7x
topology: tpu7x:2x2x1
jax: 0.10.0
libtpu: 0.0.40
codegen_flags: <defaults>
</compile_context>

<pallas_src>
import functools

import jax
import jax.numpy as jnp
from jax.experimental import pallas as pl
from jax.experimental.pallas import tpu as pltpu


def _round_up(n, m):
    return ((n + m - 1) // m) * m


def _divisors_desc(n):
    return [d for d in range(n, 0, -1) if n % d == 0]


def _vmem_limit_bytes():
    """Generation-aware scoped-VMEM request (v7x: 64 MiB physical)."""
    try:
        cap = pltpu.get_tpu_info().vmem_capacity_bytes
    except Exception:
        cap = 64 * 1024 * 1024            # conservative, v7x-sized default
    return int(min(cap * 3 // 4, 100 * 1024 * 1024))


# --------------------------------------------------------------------------
# Primary path: lane-dense output, one whole-tile relayout per grid step.
# --------------------------------------------------------------------------
def _fold_dense_kernel(x_ref, o_ref, *, C, p):
    # x_ref: (rb, Wb, C*p*p)   ->   o_ref: (C, rb*p, W)   (W = Wb*p, lane-dense)
    rb, Wb, _ = x_ref.shape
    v = x_ref[...]
    v = v.reshape(rb, Wb, C, p, p)
    v = jnp.transpose(v, (2, 0, 3, 1, 4))        # (C, rb, p, Wb, p)
    # TODO(synk): use pltpu.einshape once grouped-axis equations cover this
    # split+permute+merge in one call; it may schedule the relayout cheaper.
    o_ref[...] = v.reshape(C, rb * p, Wb * p)    # single dense store


def _pick_rb_dense(Hb, p, Wb, Cpp, C, W, esize, budget, batch):
    sub = 8 * max(1, 4 // esize)      # sublane packing: f32=8, bf16=16, int8=32

    def step_bytes(rb):               # padded VMEM footprint, double-buffered
        in_b = rb * _round_up(Wb, 8) * _round_up(Cpp, 128) * esize
        out_b = C * _round_up(rb * p, 8) * _round_up(W, 128) * esize
        return 2 * (in_b + out_b)

    cands = [rb for rb in _divisors_desc(Hb) if (rb * p) % sub == 0 or rb == Hb]
    fitting = [rb for rb in cands if step_bytes(rb) <= budget]
    pool = fitting if fitting else [min(cands)]
    if batch == 1:                    # keep >= 2 grid steps for v7x megacore
        multi = [rb for rb in pool if Hb // rb >= 2]
        if multi:
            pool = multi
    return max(pool)                  # fattest tile that fits -> few, fat steps


def _patch_unembed_dense(x, out_size, p, vmem_limit):
    B, L, Cpp = x.shape
    H, W = out_size
    Hb, Wb = H // p, W // p
    C = Cpp // (p * p)
    esize = jnp.dtype(x.dtype).itemsize
    rb = _pick_rb_dense(Hb, p, Wb, Cpp, C, W, esize, (vmem_limit * 6) // 10, B)
    x4 = x.reshape(B, Hb, Wb, Cpp)                    # free, contiguous reshape
    return pl.pallas_call(
        functools.partial(_fold_dense_kernel, C=C, p=p),
        out_shape=jax.ShapeDtypeStruct((B, C, H, W), x.dtype),
        grid=(B, Hb // rb),
        in_specs=[
            # Block spans full (Wb, Cpp) trailing dims -> contiguous HBM reads.
            pl.BlockSpec((None, rb, Wb, Cpp), lambda b, i: (b, i, 0, 0)),
        ],
        out_specs=pl.BlockSpec(
            # Lane-dense block: trailing dims (rb*p, W) -> unmasked vst.
            (None, C, rb * p, W), lambda b, i: (b, 0, i, 0)),
        compiler_params=pltpu.CompilerParams(
            dimension_semantics=("parallel", "parallel"),
            vmem_limit_bytes=vmem_limit),
    )(x4)


# --------------------------------------------------------------------------
# Fallback path (previously validated on TPU): per-(c, ki) slab copies into a
# 6-D output view.  HBM writes stay contiguous; only used if Mosaic rejects
# the in-register relayout of the dense path.
# --------------------------------------------------------------------------
def _fold_safe_kernel(x_ref, o_ref, *, C, p):
    # x_ref: (rb, Wb, C*p*p)    o_ref: (C, rb, p, Wb, p)
    pp = p * p
    for c in range(C):
        for ki in range(p):
            s = c * pp + ki * p
            o_ref[c, :, ki, :, :] = x_ref[:, :, s:s + p]


def _pick_rb_safe(Hb, p, Wb, Cpp, C, esize, budget):
    def step_bytes(rb):
        in_b = rb * _round_up(Wb, 8) * _round_up(Cpp, 128) * esize
        out_b = C * rb * p * _round_up(Wb, 8) * _round_up(p, 128) * esize
        return 2 * (in_b + out_b)

    fitting = [rb for rb in _divisors_desc(Hb) if step_bytes(rb) <= budget]
    return max(fitting) if fitting else 1


def _patch_unembed_safe(x, out_size, p, vmem_limit):
    B, L, Cpp = x.shape
    H, W = out_size
    Hb, Wb = H // p, W // p
    C = Cpp // (p * p)
    esize = jnp.dtype(x.dtype).itemsize
    rb = _pick_rb_safe(Hb, p, Wb, Cpp, C, esize, (vmem_limit * 6) // 10)
    x4 = x.reshape(B, Hb, Wb, Cpp)
    out6 = pl.pallas_call(
        functools.partial(_fold_safe_kernel, C=C, p=p),
        out_shape=jax.ShapeDtypeStruct((B, C, Hb, p, Wb, p), x.dtype),
        grid=(B, Hb // rb),
        in_specs=[pl.BlockSpec((None, rb, Wb, Cpp), lambda b, i: (b, i, 0, 0))],
        out_specs=pl.BlockSpec(
            (None, C, rb, p, Wb, p), lambda b, i: (b, 0, i, 0, 0, 0)),
        compiler_params=pltpu.CompilerParams(
            dimension_semantics=("parallel", "parallel"),
            vmem_limit_bytes=vmem_limit),
    )(x4)
    # Row-major layout of (B, C, Hb, p, Wb, p) == (B, C, H, W): free reshape.
    return out6.reshape(B, C, H, W)


# --------------------------------------------------------------------------
# Public wrapper with guarded dispatch (dense first, proven fallback second).
# --------------------------------------------------------------------------
_IMPL_CACHE = {}


def patch_unembed_pallas(x, out_size, patch_dim=3):
    """Pallas TPU Patch_UnEmbed: x (B, L, C*p*p) -> (B, C, H, W)."""
    p = patch_dim
    B, L, Cpp = x.shape
    H, W = out_size
    assert H % p == 0 and W % p == 0, "out_size must be a multiple of patch_dim"
    Hb, Wb = H // p, W // p
    assert L == Hb * Wb, "token count must equal (H//p)*(W//p)"
    assert Cpp % (p * p) == 0, "feature dim must be C * patch_dim**2"

    vmem_limit = _vmem_limit_bytes()
    key = (x.shape, str(x.dtype), (H, W), p)
    impl = _IMPL_CACHE.get(key)
    if impl == "dense":
        return _patch_unembed_dense(x, out_size, p, vmem_limit)
    if impl == "safe":
        return _patch_unembed_safe(x, out_size, p, vmem_limit)

    try:
        out = _patch_unembed_dense(x, out_size, p, vmem_limit)
        out = jax.block_until_ready(out)
        _IMPL_CACHE[key] = "dense"
        return out
    except Exception:
        # Mosaic rejected the in-register relayout -> proven slab-copy kernel.
        _IMPL_CACHE[key] = "safe"
        return _patch_unembed_safe(x, out_size, p, vmem_limit)


def patch_unembed_reference(x, out_size, patch_dim=3):
    """Pure-XLA reference (also the roofline baseline to benchmark against)."""
    p = patch_dim
    B, L, Cpp = x.shape
    H, W = out_size
    Hb, Wb = H // p, W // p
    C = Cpp // (p * p)
    x6 = x.reshape(B, Hb, Wb, C, p, p)
    x6 = jnp.transpose(x6, (0, 3, 1, 4, 2, 5))     # (B, C, Hb, p, Wb, p)
    return x6.reshape(B, C, H, W)


if __name__ == "__main__":
    # Module default patch_dim=3; small image 24x24 with 4 channels.
    B, C, H, W, p = 2, 4, 24, 24, 3
    L = (H // p) * (W // p)          # 64 patch tokens
    Cpp = C * p * p                  # 36 features per token

    key = jax.random.PRNGKey(0)
    x = jax.random.normal(key, (B, L, Cpp), dtype=jnp.float32)

    out = patch_unembed_pallas(x, (H, W), patch_dim=p)
    out = jax.block_until_ready(out)

    ref = patch_unembed_reference(x, (H, W), patch_dim=p)
    assert out.shape == (B, C, H, W)
    assert jnp.array_equal(out, ref), "mismatch vs reference fold"

    print("KERNEL_OK")
</pallas_src>

<mosaic_0001>
module attributes {stable_mosaic.version = 11 : i64} {
  func.func @_fold_dense_kernel(%arg0: i32, %arg1: i32, %arg2: memref<1x8x8x36xf32, #tpu.memory_space<vmem>>, %arg3: memref<1x4x24x24xf32, #tpu.memory_space<vmem>>) attributes {dimension_semantics = [#tpu.dimension_semantics<parallel>, #tpu.dimension_semantics<parallel>], iteration_bounds = array<i64: 2, 1>, scalar_prefetch = 0 : i64, scratch_operands = 0 : i64, tpu.core_type = #tpu.core_type<tc>, window_params = [{transform_indices = @transform_0, window_bounds = array<i64: 1, 8, 8, 36>}, {transform_indices = @transform_1, window_bounds = array<i64: 1, 4, 24, 24>}]} {
    %c0 = arith.constant 0 : index
    %c0_0 = arith.constant 0 : index
    %c0_1 = arith.constant 0 : index
    %c0_2 = arith.constant 0 : index
    %0 = vector.load %arg2[%c0, %c0_0, %c0_1, %c0_2] : memref<1x8x8x36xf32, #tpu.memory_space<vmem>>, vector<1x8x8x36xf32>
    %1 = vector.shape_cast %0 : vector<1x8x8x36xf32> to vector<8x8x36xf32>
    %2 = vector.shape_cast %1 : vector<8x8x36xf32> to vector<8x8x4x3x3xf32>
    %3 = tpu.transpose %2, [2, 0, 3, 1, 4] : vector<8x8x4x3x3xf32> -> vector<4x8x3x8x3xf32>
    %4 = vector.shape_cast %3 : vector<4x8x3x8x3xf32> to vector<4x24x24xf32>
    %c0_3 = arith.constant 0 : index
    %c0_4 = arith.constant 0 : index
    %c0_5 = arith.constant 0 : index
    %c0_6 = arith.constant 0 : index
    %5 = vector.load %arg3[%c0_3, %c0_4, %c0_5, %c0_6] : memref<1x4x24x24xf32, #tpu.memory_space<vmem>>, vector<1x4x24x24xf32>
    %6 = vector.shape_cast %5 : vector<1x4x24x24xf32> to vector<4x24x24xf32>
    %7 = vector.shape_cast %4 : vector<4x24x24xf32> to vector<1x4x24x24xf32>
    tpu.vector_store %arg3[%c0_3, %c0_4, %c0_5, %c0_6], %7 {strides = array<i32>} : memref<1x4x24x24xf32, #tpu.memory_space<vmem>>, vector<1x4x24x24xf32>,
    return
  }
  func.func @transform_0(%arg0: i32, %arg1: i32) -> (i32, i32, i32, i32) {
    %c0_i32 = arith.constant 0 : i32
    %c0_i32_0 = arith.constant 0 : i32
    %c0_i32_1 = arith.constant 0 : i32
    return %arg0, %arg1, %c0_i32, %c0_i32_0 : i32, i32, i32, i32
  }
  func.func @transform_1(%arg0: i32, %arg1: i32) -> (i32, i32, i32, i32) {
    %c0_i32 = arith.constant 0 : i32
    %c0_i32_0 = arith.constant 0 : i32
    %c0_i32_1 = arith.constant 0 : i32
    return %arg0, %c0_i32, %arg1, %c0_i32_0 : i32, i32, i32, i32
  }
}

module attributes {stable_mosaic.version = 11 : i64} {
  func.func @_fold_safe_kernel(%arg0: i32, %arg1: i32, %arg2: memref<1x8x8x36xf32, #tpu.memory_space<vmem>>, %arg3: memref<1x4x8x3x8x3xf32, #tpu.memory_space<vmem>>) attributes {dimension_semantics = [#tpu.dimension_semantics<parallel>, #tpu.dimension_semantics<parallel>], iteration_bounds = array<i64: 2, 1>, scalar_prefetch = 0 : i64, scratch_operands = 0 : i64, tpu.core_type = #tpu.core_type<tc>, window_params = [{transform_indices = @transform_0, window_bounds = array<i64: 1, 8, 8, 36>}, {transform_indices = @transform_1, window_bounds = array<i64: 1, 4, 8, 3, 8, 3>}]} {
    %c0 = arith.constant 0 : index
    %c0_0 = arith.constant 0 : index
    %c0_1 = arith.constant 0 : index
    %c0_2 = arith.constant 0 : index
    %0 = vector.load %arg2[%c0, %c0_0, %c0_1, %c0_2] : memref<1x8x8x36xf32, #tpu.memory_space<vmem>>, vector<1x8x8x3xf32>
    %1 = vector.shape_cast %0 : vector<1x8x8x3xf32> to vector<8x8x3xf32>
    %c0_3 = arith.constant 0 : index
    %c0_4 = arith.constant 0 : index
    %c0_5 = arith.constant 0 : index
    %c0_6 = arith.constant 0 : index
    %c0_7 = arith.constant 0 : index
    %c0_8 = arith.constant 0 : index
    %2 = vector.load %arg3[%c0_3, %c0_4, %c0_5, %c0_6, %c0_7, %c0_8] : memref<1x4x8x3x8x3xf32, #tpu.memory_space<vmem>>, vector<1x1x8x1x8x3xf32>
    %3 = vector.shape_cast %2 : vector<1x1x8x1x8x3xf32> to vector<8x8x3xf32>
    %4 = vector.shape_cast %1 : vector<8x8x3xf32> to vector<1x1x8x1x8x3xf32>
    tpu.vector_store %arg3[%c0_3, %c0_4, %c0_5, %c0_6, %c0_7, %c0_8], %4 {strides = array<i32>} : memref<1x4x8x3x8x3xf32, #tpu.memory_space<vmem>>, vector<1x1x8x1x8x3xf32>,
    %c0_9 = arith.constant 0 : index
    %c0_10 = arith.constant 0 : index
    %c0_11 = arith.constant 0 : index
    %c3 = arith.constant 3 : index
    %5 = vector.load %arg2[%c0_9, %c0_10, %c0_11, %c3] : memref<1x8x8x36xf32, #tpu.memory_space<vmem>>, vector<1x8x8x3xf32>
    %6 = vector.shape_cast %5 : vector<1x8x8x3xf32> to vector<8x8x3xf32>
    %c0_12 = arith.constant 0 : index
    %c0_13 = arith.constant 0 : index
    %c0_14 = arith.constant 0 : index
    %c1 = arith.constant 1 : index
    %c0_15 = arith.constant 0 : index
    %c0_16 = arith.constant 0 : index
    %7 = vector.load %arg3[%c0_12, %c0_13, %c0_14, %c1, %c0_15, %c0_16] : memref<1x4x8x3x8x3xf32, #tpu.memory_space<vmem>>, vector<1x1x8x1x8x3xf32>
    %8 = vector.shape_cast %7 : vector<1x1x8x1x8x3xf32> to vector<8x8x3xf32>
    %9 = vector.shape_cast %6 : vector<8x8x3xf32> to vector<1x1x8x1x8x3xf32>
    tpu.vector_store %arg3[%c0_12, %c0_13, %c0_14, %c1, %c0_15, %c0_16], %9 {strides = array<i32>} : memref<1x4x8x3x8x3xf32, #tpu.memory_space<vmem>>, vector<1x1x8x1x8x3xf32>,
    %c0_17 = arith.constant 0 : index
    %c0_18 = arith.constant 0 : index
    %c0_19 = arith.constant 0 : index
    %c6 = arith.constant 6 : index
    %10 = vector.load %arg2[%c0_17, %c0_18, %c0_19, %c6] : memref<1x8x8x36xf32, #tpu.memory_space<vmem>>, vector<1x8x8x3xf32>
    %11 = vector.shape_cast %10 : vector<1x8x8x3xf32> to vector<8x8x3xf32>
    %c0_20 = arith.constant 0 : index
    %c0_21 = arith.constant 0 : index
    %c0_22 = arith.constant 0 : index
    %c2 = arith.constant 2 : index
    %c0_23 = arith.constant 0 : index
    %c0_24 = arith.constant 0 : index
    %12 = vector.load %arg3[%c0_20, %c0_21, %c0_22, %c2, %c0_23, %c0_24] : memref<1x4x8x3x8x3xf32, #tpu.memory_space<vmem>>, vector<1x1x8x1x8x3xf32>
    %13 = vector.shape_cast %12 : vector<1x1x8x1x8x3xf32> to vector<8x8x3xf32>
    %14 = vector.shape_cast %11 : vector<8x8x3xf32> to vector<1x1x8x1x8x3xf32>
    tpu.vector_store %arg3[%c0_20, %c0_21, %c0_22, %c2, %c0_23, %c0_24], %14 {strides = array<i32>} : memref<1x4x8x3x8x3xf32, #tpu.memory_space<vmem>>, vector<1x1x8x1x8x3xf32>,
    %c0_25 = arith.constant 0 : index
    %c0_26 = arith.constant 0 : index
    %c0_27 = arith.constant 0 : index
    %c9 = arith.constant 9 : index
    %15 = vector.load %arg2[%c0_25, %c0_26, %c0_27, %c9] : memref<1x8x8x36xf32, #tpu.memory_space<vmem>>, vector<1x8x8x3xf32>
    %16 = vector.shape_cast %15 : vector<1x8x8x3xf32> to vector<8x8x3xf32>
    %c0_28 = arith.constant 0 : index
    %c1_29 = arith.constant 1 : index
    %c0_30 = arith.constant 0 : index
    %c0_31 = arith.constant 0 : index
    %c0_32 = arith.constant 0 : index
    %c0_33 = arith.constant 0 : index
    %17 = vector.load %arg3[%c0_28, %c1_29, %c0_30, %c0_31, %c0_32, %c0_33] : memref<1x4x8x3x8x3xf32, #tpu.memory_space<vmem>>, vector<1x1x8x1x8x3xf32>
    %18 = vector.shape_cast %17 : vector<1x1x8x1x8x3xf32> to vector<8x8x3xf32>
    %19 = vector.shape_cast %16 : vector<8x8x3xf32> to vector<1x1x8x1x8x3xf32>
    tpu.vector_store %arg3[%c0_28, %c1_29, %c0_30, %c0_31, %c0_32, %c0_33], %19 {strides = array<i32>} : memref<1x4x8x3x8x3xf32, #tpu.memory_space<vmem>>, vector<1x1x8x1x8x3xf32>,
    %c0_34 = arith.constant 0 : index
    %c0_35 = arith.constant 0 : index
    %c0_36 = arith.constant 0 : index
    %c12 = arith.constant 12 : index
    %20 = vector.load %arg2[%c0_34, %c0_35, %c0_36, %c12] : memref<1x8x8x36xf32, #tpu.memory_space<vmem>>, vector<1x8x8x3xf32>
    %21 = vector.shape_cast %20 : vector<1x8x8x3xf32> to vector<8x8x3xf32>
    %c0_37 = arith.constant 0 : index
    %c1_38 = arith.constant 1 : index
    %c0_39 = arith.constant 0 : index
    %c1_40 = arith.constant 1 : index
    %c0_41 = arith.constant 0 : index
    %c0_42 = arith.constant 0 : index
    %22 = vector.load %arg3[%c0_37, %c1_38, %c0_39, %c1_40, %c0_41, %c0_42] : memref<1x4x8x3x8x3xf32, #tpu.memory_space<vmem>>, vector<1x1x8x1x8x3xf32>
    %23 = vector.shape_cast %22 : vector<1x1x8x1x8x3xf32> to vector<8x8x3xf32>
    %24 = vector.shape_cast %21 : vector<8x8x3xf32> to vector<1x1x8x1x8x3xf32>
    tpu.vector_store %arg3[%c0_37, %c1_38, %c0_39, %c1_40, %c0_41, %c0_42], %24 {strides = array<i32>} : memref<1x4x8x3x8x3xf32, #tpu.memory_space<vmem>>, vector<1x1x8x1x8x3xf32>,
    %c0_43 = arith.constant 0 : index
    %c0_44 = arith.constant 0 : index
    %c0_45 = arith.constant 0 : index
    %c15 = arith.constant 15 : index
    %25 = vector.load %arg2[%c0_43, %c0_44, %c0_45, %c15] : memref<1x8x8x36xf32, #tpu.memory_space<vmem>>, vector<1x8x8x3xf32>
    %26 = vector.shape_cast %25 : vector<1x8x8x3xf32> to vector<8x8x3xf32>
    %c0_46 = arith.constant 0 : index
    %c1_47 = arith.constant 1 : index
    %c0_48 = arith.constant 0 : index
    %c2_49 = arith.constant 2 : index
    %c0_50 = arith.constant 0 : index
    %c0_51 = arith.constant 0 : index
    %27 = vector.load %arg3[%c0_46, %c1_47, %c0_48, %c2_49, %c0_50, %c0_51] : memref<1x4x8x3x8x3xf32, #tpu.memory_space<vmem>>, vector<1x1x8x1x8x3xf32>
    %28 = vector.shape_cast %27 : vector<1x1x8x1x8x3xf32> to vector<8x8x3xf32>
    %29 = vector.shape_cast %26 : vector<8x8x3xf32> to vector<1x1x8x1x8x3xf32>
    tpu.vector_store %arg3[%c0_46, %c1_47, %c0_48, %c2_49, %c0_50, %c0_51], %29 {strides = array<i32>} : memref<1x4x8x3x8x3xf32, #tpu.memory_space<vmem>>, vector<1x1x8x1x8x3xf32>,
    %c0_52 = arith.constant 0 : index
    %c0_53 = arith.constant 0 : index
    %c0_54 = arith.constant 0 : index
    %c18 = arith.constant 18 : index
    %30 = vector.load %arg2[%c0_52, %c0_53, %c0_54, %c18] : memref<1x8x8x36xf32, #tpu.memory_space<vmem>>, vector<1x8x8x3xf32>
    %31 = vector.shape_cast %30 : vector<1x8x8x3xf32> to vector<8x8x3xf32>
    %c0_55 = arith.constant 0 : index
    %c2_56 = arith.constant 2 : index
    %c0_57 = arith.constant 0 : index
    %c0_58 = arith.constant 0 : index
    %c0_59 = arith.constant 0 : index
    %c0_60 = arith.constant 0 : index
    %32 = vector.load %arg3[%c0_55, %c2_56, %c0_57, %c0_58, %c0_59, %c0_60] : memref<1x4x8x3x8x3xf32, #tpu.memory_space<vmem>>, vector<1x1x8x1x8x3xf32>
    %33 = vector.shape_cast %32 : vector<1x1x8x1x8x3xf32> to vector<8x8x3xf32>
    %34 = vector.shape_cast %31 : vector<8x8x3xf32> to vector<1x1x8x1x8x3xf32>
    tpu.vector_store %arg3[%c0_55, %c2_56, %c0_57, %c0_58, %c0_59, %c0_60], %34 {strides = array<i32>} : memref<1x4x8x3x8x3xf32, #tpu.memory_space<vmem>>, vector<1x1x8x1x8x3xf32>,
    %c0_61 = arith.constant 0 : index
    %c0_62 = arith.constant 0 : index
    %c0_63 = arith.constant 0 : index
    %c21 = arith.constant 21 : index
    %35 = vector.load %arg2[%c0_61, %c0_62, %c0_63, %c21] : memref<1x8x8x36xf32, #tpu.memory_space<vmem>>, vector<1x8x8x3xf32>
    %36 = vector.shape_cast %35 : vector<1x8x8x3xf32> to vector<8x8x3xf32>
    %c0_64 = arith.constant 0 : index
    %c2_65 = arith.constant 2 : index
    %c0_66 = arith.constant 0 : index
    %c1_67 = arith.constant 1 : index
    %c0_68 = arith.constant 0 : index
    %c0_69 = arith.constant 0 : index
    %37 = vector.load %arg3[%c0_64, %c2_65, %c0_66, %c1_67, %c0_68, %c0_69] : memref<1x4x8x3x8x3xf32, #tpu.memory_space<vmem>>, vector<1x1x8x1x8x3xf32>
    %38 = vector.shape_cast %37 : vector<1x1x8x1x8x3xf32> to vector<8x8x3xf32>
    %39 = vector.shape_cast %36 : vector<8x8x3xf32> to vector<1x1x8x1x8x3xf32>
    tpu.vector_store %arg3[%c0_64, %c2_65, %c0_66, %c1_67, %c0_68, %c0_69], %39 {strides = array<i32>} : memref<1x4x8x3x8x3xf32, #tpu.memory_space<vmem>>, vector<1x1x8x1x8x3xf32>,
    %c0_70 = arith.constant 0 : index
    %c0_71 = arith.constant 0 : index
    %c0_72 = arith.constant 0 : index
    %c24 = arith.constant 24 : index
    %40 = vector.load %arg2[%c0_70, %c0_71, %c0_72, %c24] : memref<1x8x8x36xf32, #tpu.memory_space<vmem>>, vector<1x8x8x3xf32>
    %41 = vector.shape_cast %40 : vector<1x8x8x3xf32> to vector<8x8x3xf32>
    %c0_73 = arith.constant 0 : index
    %c2_74 = arith.constant 2 : index
    %c0_75 = arith.constant 0 : index
    %c2_76 = arith.constant 2 : index
    %c0_77 = arith.constant 0 : index
    %c0_78 = arith.constant 0 : index
    %42 = vector.load %arg3[%c0_73, %c2_74, %c0_75, %c2_76, %c0_77, %c0_78] : memref<1x4x8x3x8x3xf32, #tpu.memory_space<vmem>>, vector<1x1x8x1x8x3xf32>
    %43 = vector.shape_cast %42 : vector<1x1x8x1x8x3xf32> to vector<8x8x3xf32>
    %44 = vector.shape_cast %41 : vector<8x8x3xf32> to vector<1x1x8x1x8x3xf32>
    tpu.vector_store %arg3[%c0_73, %c2_74, %c0_75, %c2_76, %c0_77, %c0_78], %44 {strides = array<i32>} : memref<1x4x8x3x8x3xf32, #tpu.memory_space<vmem>>, vector<1x1x8x1x8x3xf32>,
    %c0_79 = arith.constant 0 : index
    %c0_80 = arith.constant 0 : index
    %c0_81 = arith.constant 0 : index
    %c27 = arith.constant 27 : index
    %45 = vector.load %arg2[%c0_79, %c0_80, %c0_81, %c27] : memref<1x8x8x36xf32, #tpu.memory_space<vmem>>, vector<1x8x8x3xf32>
    %46 = vector.shape_cast %45 : vector<1x8x8x3xf32> to vector<8x8x3xf32>
    %c0_82 = arith.constant 0 : index
    %c3_83 = arith.constant 3 : index
    %c0_84 = arith.constant 0 : index
    %c0_85 = arith.constant 0 : index
    %c0_86 = arith.constant 0 : index
    %c0_87 = arith.constant 0 : index
    %47 = vector.load %arg3[%c0_82, %c3_83, %c0_84, %c0_85, %c0_86, %c0_87] : memref<1x4x8x3x8x3xf32, #tpu.memory_space<vmem>>, vector<1x1x8x1x8x3xf32>
    %48 = vector.shape_cast %47 : vector<1x1x8x1x8x3xf32> to vector<8x8x3xf32>
    %49 = vector.shape_cast %46 : vector<8x8x3xf32> to vector<1x1x8x1x8x3xf32>
    tpu.vector_store %arg3[%c0_82, %c3_83, %c0_84, %c0_85, %c0_86, %c0_87], %49 {strides = array<i32>} : memref<1x4x8x3x8x3xf32, #tpu.memory_space<vmem>>, vector<1x1x8x1x8x3xf32>,
    %c0_88 = arith.constant 0 : index
    %c0_89 = arith.constant 0 : index
    %c0_90 = arith.constant 0 : index
    %c30 = arith.constant 30 : index
    %50 = vector.load %arg2[%c0_88, %c0_89, %c0_90, %c30] : memref<1x8x8x36xf32, #tpu.memory_space<vmem>>, vector<1x8x8x3xf32>
    %51 = vector.shape_cast %50 : vector<1x8x8x3xf32> to vector<8x8x3xf32>
    %c0_91 = arith.constant 0 : index
    %c3_92 = arith.constant 3 : index
    %c0_93 = arith.constant 0 : index
    %c1_94 = arith.constant 1 : index
    %c0_95 = arith.constant 0 : index
    %c0_96 = arith.constant 0 : index
    %52 = vector.load %arg3[%c0_91, %c3_92, %c0_93, %c1_94, %c0_95, %c0_96] : memref<1x4x8x3x8x3xf32, #tpu.memory_space<vmem>>, vector<1x1x8x1x8x3xf32>
    %53 = vector.shape_cast %52 : vector<1x1x8x1x8x3xf32> to vector<8x8x3xf32>
    %54 = vector.shape_cast %51 : vector<8x8x3xf32> to vector<1x1x8x1x8x3xf32>
    tpu.vector_store %arg3[%c0_91, %c3_92, %c0_93, %c1_94, %c0_95, %c0_96], %54 {strides = array<i32>} : memref<1x4x8x3x8x3xf32, #tpu.memory_space<vmem>>, vector<1x1x8x1x8x3xf32>,
    %c0_97 = arith.constant 0 : index
    %c0_98 = arith.constant 0 : index
    %c0_99 = arith.constant 0 : index
    %c33 = arith.constant 33 : index
    %55 = vector.load %arg2[%c0_97, %c0_98, %c0_99, %c33] : memref<1x8x8x36xf32, #tpu.memory_space<vmem>>, vector<1x8x8x3xf32>
    %56 = vector.shape_cast %55 : vector<1x8x8x3xf32> to vector<8x8x3xf32>
    %c0_100 = arith.constant 0 : index
    %c3_101 = arith.constant 3 : index
    %c0_102 = arith.constant 0 : index
    %c2_103 = arith.constant 2 : index
    %c0_104 = arith.constant 0 : index
    %c0_105 = arith.constant 0 : index
    %57 = vector.load %arg3[%c0_100, %c3_101, %c0_102, %c2_103, %c0_104, %c0_105] : memref<1x4x8x3x8x3xf32, #tpu.memory_space<vmem>>, vector<1x1x8x1x8x3xf32>
    %58 = vector.shape_cast %57 : vector<1x1x8x1x8x3xf32> to vector<8x8x3xf32>
    %59 = vector.shape_cast %56 : vector<8x8x3xf32> to vector<1x1x8x1x8x3xf32>
    tpu.vector_store %arg3[%c0_100, %c3_101, %c0_102, %c2_103, %c0_104, %c0_105], %59 {strides = array<i32>} : memref<1x4x8x3x8x3xf32, #tpu.memory_space<vmem>>, vector<1x1x8x1x8x3xf32>,
    return
  }
  func.func @transform_0(%arg0: i32, %arg1: i32) -> (i32, i32, i32, i32) {
    %c0_i32 = arith.constant 0 : i32
    %c0_i32_0 = arith.constant 0 : i32
    %c0_i32_1 = arith.constant 0 : i32
    return %arg0, %arg1, %c0_i32, %c0_i32_0 : i32, i32, i32, i32
  }
  func.func @transform_1(%arg0: i32, %arg1: i32) -> (i32, i32, i32, i32, i32, i32) {
    %c0_i32 = arith.constant 0 : i32
    %c0_i32_0 = arith.constant 0 : i32
    %c0_i32_1 = arith.constant 0 : i32
    %c0_i32_2 = arith.constant 0 : i32
    %c0_i32_3 = arith.constant 0 : i32
    return %arg0, %c0_i32, %arg1, %c0_i32_0, %c0_i32_1, %c0_i32_2 : i32, i32, i32, i32, i32, i32
  }
}

</mosaic_0001>

<bundles_post_ra>
// kernel: tpu_custom_call.1
= control target key start
LH: loop header
LB: loop body
LE: loop exit
PB: predicated region body
PF: predicated region fallthrough
CT: control target
= control target key end

     0   :  { %6 = vsyncpa [#allocation3], 0  ;;  %s1530_s0 = inlined_call_operand.hbm [shape: f32[2,8,8,36], index: 0, kind: input, shape index: {}]   ;;  %s1531_s1 = inlined_call_operand.vmem [shape: f32[2,4,8,3,8,3], index: 1, kind: output, shape index: {}]  }
   0x1   :  { %8 = vsyncpa [#allocation3 + $0x1], 0  ;;  %s1100_s6 = smov 0   ;;  %s1102_s7 = smov 0  }
   0x2   :  { %s1104_s8 = smov 0   ;;  %s1106_s9 = smov 0  }
   0x3   :  { %s1108_s10 = smov 0   ;;  %s1110_s11 = smov 0  }
   0x4 LB: > { %s824_s12 = sadd.s32 4294967295, %s1074_s11   ;;  %s26_s13 = sadd.s32 1, %s1070_s10  ;;  %s1074_s11 = sphi %s1110_s11, %s14_s11   ;;  %s1070_s10 = sphi %s1108_s10, %s1539_s10   ;;  %s1066_s9 = sphi %s1106_s9, %s1538_s9   ;;  %s1062_s8 = sphi %s1104_s8, %s1537_s8   ;;  %s1058_s7 = sphi %s1102_s7, %s1536_s7   ;;  %s1054_s6 = sphi %s1100_s6, %s1535_s6  }
   0x5   : > { %p28_p0 = scmp.ge.s32.totalorder %s26_s13, 2  ;;  %s35_s14 = sadd.s32 1, %s1062_s8 }
   0x6   : > { %p42_p1 = scmp.ne.s32.totalorder %s1062_s8, %s1058_s7  ;;  %p43_p2 = scmp.eq.s32.totalorder %s1074_s11, 0 }
   0x7   : > { %s1541_s13 = smov (%p28_p0, %s26_s13), 0  ;;  %p48_p4 = scmp.ne.s32.totalorder %s1058_s7, %s1054_s6 }
   0x8   : > { %p1136_p3 = por %p43_p2, %p42_p1  ;;  %s30_s16 = ssub.s32 %s1070_s10, %s1541_s13 }
   0x9   : > { %p49_p5 = scmp.eq.s32.totalorder %s824_s12, 0  ;;  %p33_p6 = scmp.eq.s32.totalorder %s30_s16, 0 }
   0xa   : > { %p932_p8 = scmp.lt.s32.totalorder %s1074_s11, 2  ;;  %s100_s19 = sand.u32 1, %s1062_s8  }
   0xb   : > { %p1143_p7 = por %p49_p5, %p48_p4  ;;  %s924_s20 = sshll.u32 %s1070_s10, 10 }
   0xc   : > { %s1149_s18 = scalar_select %p33_p6, %s1062_s8, %s35_s14  }
   0xd   : > { %s828_s21 = sshll.u32 %s100_s19, 6  ;;  %s1156_s24 = scalar_lea.hbm %s1530_s0, %s924_s20 }
   0xe   : > { %s104_s25 = scalar_lea.vmem [#allocation2], %s828_s21  ;;  %p1160_p9 = pnand %p932_p8, %p1136_p3 }
   0xf   : > { %s113_s26 = sshll.u32 %s104_s25, 4  ;;  %s1166_s28 = scalar_lea.sflag [#allocation3], %s100_s19  ;;  %s1164_s26 = int_to_ptr.vmem [resolvable:$true] %s113_s26 }
  0x10   : > { %s994_s29 = scalar_lea.hbm %s1156_s24, 1024  ;;  %p996_p11 = pneg %p1160_p9 }
  0x11   : > { %p995_p10 = scmp.ne.s32.totalorder %s1156_s24, %s994_s29  ;;  %s999_s3 = scalar_lea.hbm %s1530_s0, 2048 }
  0x12   : > { %p1000_p0 = scmp.lt.u32.totalorder %s1156_s24, %s1530_s0  ;;  %p1001_p1 = scmp.lt.u32.totalorder %s999_s3, %s994_s29 }
  0x13   : > { %p997_p12 = pnand %p996_p11, %p995_p10  ;;  %p1003_p3 = scmp.lt.u32.totalorder %s994_s29, %s1156_s24 }
  0x14   : > { %p1002_p2 = por %p1001_p1, %p1000_p0 }
  0x15   : > { %p998_p13 = pneg %p997_p12 }
  0x16   : > { %p1004_p4 = por %p1003_p3, %p1002_p2 }
  0x18   : > { %p1005_p5 = pnand %p1004_p4, %p998_p13 }
  0x1a   : > { %1008 = shalt.err (!%p1005_p5)
}
  0x1b   : > { %s1009_s6 = scalar_lea.vmem %s1164_s26, 1024  ;;  %s1076_s12 = smov [#allocation2]  }
  0x1c   : > { %p1010_p6 = scmp.ne.s32.totalorder %s1164_s26, %s1009_s6  ;;  %s1014_s14 = sshll.u32 %s1076_s12, 4  ;;  %s1015_s14 = int_to_ptr.vmem [resolvable:$false] %s1014_s14 }
  0x1d   : > { %s1016_s15 = scalar_lea.vmem %s1015_s14, 2048  ;;  %p1017_p12 = scmp.lt.s32.totalorder %s1164_s26, %s1015_s14 }
  0x1e   : > { %p1012_p8 = pnand %p1010_p6, %p996_p11  ;;  %p1018_p0 = scmp.lt.s32.totalorder %s1016_s15, %s1009_s6 }
  0x20   : > { %p1013_p10 = pneg %p1012_p8  ;;  %p1019_p1 = por %p1018_p0, %p1017_p12 }
  0x22   : > { %p1020_p2 = pnand %p1019_p1, %p1013_p10 }
  0x24   : > { %1023 = shalt.err (!%p1020_p2)
}
  0x25   : > { %s1077_s16 = smov 128   ;;  %s1078_s19 = smov 8  }
  0x26   : > { %931 = dma.hbm_to_vmem [thread:$0]  (!%p1160_p9), %s1156_s24, 1024, %s1164_s26, %s1166_s28, %s1077_s16, %s1077_s16, %s1078_s19  }
  0x27   : > { %p831_p11 = scmp.ge.s32.totalorder %s1074_s11, 1  ;;  %p121_p13 = scmp.lt.s32.totalorder %s1074_s11, 3 }
  0x29   : > { %p122_p3 = pnand %p831_p11, %p121_p13 }
  0x2a   : > { %s127_s20 = sand.u32 (!%p122_p3), 1, %s1058_s7  }
  0x2b   : > { %125 = sbr.rel (%p122_p3) target bundleno = 343 (0x157), region = 24  ;;  %s832_s21 = sshll.u32 (!%p122_p3), %s127_s20, 6 }
  0x2c   : > { %s128_s22 = scalar_lea.sflag (!%p122_p3), [#allocation3], %s127_s20  ;;  %s131_s23 = scalar_lea.vmem (!%p122_p3), [#allocation2], %s832_s21 }
  0x32   : > { %1049 = dma.done.wait (%p1143_p7), %s128_s22, 1024  }
  0x33   : > { %1051 = vsyncadd (%p1143_p7), %s128_s22, 4294966272  ;;  %p157_p4 = scmp.lt.s32.totalorder %s1066_s9, 1  ;;  %v1208_v0 = vld [vmem:[%s131_s23] sm:$0xff]  ;;  %v1210_v1 = vld [vmem:[%s131_s23 + $0x8] sm:$0xff]  ;;  %vm175_vm0 = vcmask 23552   ;;  %s1080_s17 = smov 122  }
  0x34   : > { %v1212_v2 = vld [vmem:[%s131_s23 + $0x10] sm:$0xff]  ;;  %v1214_v3 = vld [vmem:[%s131_s23 + $0x18] sm:$0xff]  ;;  %v1216_v4 = vld [vmem:[%s131_s23 + $0x20] sm:$0xff]  ;;  %s1081_s28 = smov 119   ;;  %s1082_s29 = smov 116  }
  0x35   : > { %s1543_s9 = smov (!%p157_p4, %s1066_s9), 1  ;;  %v1218_v5 = vld [vmem:[%s131_s23 + $0x28] sm:$0xff]  ;;  %v1230_v6 = vld [vmem:[%s131_s23 + $0x30] sm:$0xff]  ;;  %v1232_v7 = vld [vmem:[%s131_s23 + $0x38] sm:$0xff]  ;;  %s1083_s30 = smov 113  }
  0x36   : > { %s925_s24 = smul.u32 768, %s1543_s9  ;;  %s1079_s9 = smov 125  }
  0x37   : > { %204 = vrot.lane.b32.xlu1 %v1212_v2, %s1079_s9  ;;  %200 = vrot.lane.b32.xlu0 %v1208_v0, %s1079_s9  ;;  %s1084_s2 = smov 110   ;;  %s1085_s3 = smov 107  }
  0x38   : > { %s1206_s27 = scalar_lea.vmem %s1531_s1, %s925_s24  ;;  %s1086_s4 = smov 104  }
  0x39   : > { %176 = vst.msk [vmem:[%s1206_s27] sm:$0xff] %vm175_vm0, %v1208_v0  ;;  %177 = vst.msk [vmem:[%s1206_s27 + $0x18] sm:$0xff] %vm175_vm0, %v1210_v1  ;;  %s1087_s5 = smov 101   ;;  %s1088_s6 = smov 98  }
  0x3a   : > { %178 = vst.msk [vmem:[%s1206_s27 + $0x30] sm:$0xff] %vm175_vm0, %v1212_v2  ;;  %179 = vst.msk [vmem:[%s1206_s27 + $0x48] sm:$0xff] %vm175_vm0, %v1214_v3  ;;  %s1089_s12 = smov 95  }
  0x3b   : > { %180 = vst.msk [vmem:[%s1206_s27 + $0x60] sm:$0xff] %vm175_vm0, %v1216_v4  ;;  %181 = vst.msk [vmem:[%s1206_s27 + $0x78] sm:$0xff] %vm175_vm0, %v1218_v5  ;;  %206 = vrot.lane.b32.xlu1 %v1214_v3, %s1079_s9  ;;  %202 = vrot.lane.b32.xlu0 %v1210_v1, %s1079_s9 }
  0x3c   : > { %182 = vst.msk [vmem:[%s1206_s27 + $0x90] sm:$0xff] %vm175_vm0, %v1230_v6  ;;  %183 = vst.msk [vmem:[%s1206_s27 + $0xa8] sm:$0xff] %vm175_vm0, %v1232_v7 }
  0x3f   : > { %210 = vrot.lane.b32.xlu1 %v1218_v5, %s1079_s9  ;;  %208 = vrot.lane.b32.xlu0 %v1216_v4, %s1079_s9 }
  0x43   : > { %214 = vrot.lane.b32.xlu1 %v1232_v7, %s1079_s9  ;;  %212 = vrot.lane.b32.xlu0 %v1230_v6, %s1079_s9 }
  0x47   : > { %251 = vrot.lane.b32.xlu1 %v1210_v1, %s1080_s17  ;;  %249 = vrot.lane.b32.xlu0 %v1208_v0, %s1080_s17 }
  0x4b   : > { %255 = vrot.lane.b32.xlu1 %v1214_v3, %s1080_s17  ;;  %253 = vrot.lane.b32.xlu0 %v1212_v2, %s1080_s17 }
  0x4f   : > { %259 = vrot.lane.b32.xlu1 %v1218_v5, %s1080_s17  ;;  %257 = vrot.lane.b32.xlu0 %v1216_v4, %s1080_s17 }
  0x53   : > { %263 = vrot.lane.b32.xlu1 %v1232_v7, %s1080_s17  ;;  %261 = vrot.lane.b32.xlu0 %v1230_v6, %s1080_s17 }
  0x57   : > { %300 = vrot.lane.b32.xlu1 %v1210_v1, %s1081_s28  ;;  %298 = vrot.lane.b32.xlu0 %v1208_v0, %s1081_s28 }
  0x5b   : > { %304 = vrot.lane.b32.xlu1 %v1214_v3, %s1081_s28  ;;  %302 = vrot.lane.b32.xlu0 %v1212_v2, %s1081_s28 }
  0x5f   : > { %308 = vrot.lane.b32.xlu1 %v1218_v5, %s1081_s28  ;;  %306 = vrot.lane.b32.xlu0 %v1216_v4, %s1081_s28 }
  0x63   : > { %312 = vrot.lane.b32.xlu1 %v1232_v7, %s1081_s28  ;;  %310 = vrot.lane.b32.xlu0 %v1230_v6, %s1081_s28 }
  0x67   : > { %349 = vrot.lane.b32.xlu1 %v1210_v1, %s1082_s29  ;;  %347 = vrot.lane.b32.xlu0 %v1208_v0, %s1082_s29 }
  0x6b   : > { %353 = vrot.lane.b32.xlu1 %v1214_v3, %s1082_s29  ;;  %351 = vrot.lane.b32.xlu0 %v1212_v2, %s1082_s29 }
  0x6f   : > { %357 = vrot.lane.b32.xlu1 %v1218_v5, %s1082_s29  ;;  %355 = vrot.lane.b32.xlu0 %v1216_v4, %s1082_s29 }
  0x73   : > { %361 = vrot.lane.b32.xlu1 %v1232_v7, %s1082_s29  ;;  %359 = vrot.lane.b32.xlu0 %v1230_v6, %s1082_s29 }
  0x77   : > { %398 = vrot.lane.b32.xlu1 %v1210_v1, %s1083_s30  ;;  %396 = vrot.lane.b32.xlu0 %v1208_v0, %s1083_s30 }
  0x7b   : > { %402 = vrot.lane.b32.xlu1 %v1214_v3, %s1083_s30  ;;  %400 = vrot.lane.b32.xlu0 %v1212_v2, %s1083_s30 }
  0x7f   : > { %406 = vrot.lane.b32.xlu1 %v1218_v5, %s1083_s30  ;;  %404 = vrot.lane.b32.xlu0 %v1216_v4, %s1083_s30 }
  0x83   : > { %410 = vrot.lane.b32.xlu1 %v1232_v7, %s1083_s30  ;;  %408 = vrot.lane.b32.xlu0 %v1230_v6, %s1083_s30 }
  0x87   : > { %447 = vrot.lane.b32.xlu1 %v1210_v1, %s1084_s2  ;;  %445 = vrot.lane.b32.xlu0 %v1208_v0, %s1084_s2 }
  0x8b   : > { %451 = vrot.lane.b32.xlu1 %v1214_v3, %s1084_s2  ;;  %449 = vrot.lane.b32.xlu0 %v1212_v2, %s1084_s2 }
  0x8f   : > { %455 = vrot.lane.b32.xlu1 %v1218_v5, %s1084_s2  ;;  %453 = vrot.lane.b32.xlu0 %v1216_v4, %s1084_s2 }
  0x93   : > { %459 = vrot.lane.b32.xlu1 %v1232_v7, %s1084_s2  ;;  %457 = vrot.lane.b32.xlu0 %v1230_v6, %s1084_s2 }
  0x97   : > { %496 = vrot.lane.b32.xlu1 %v1210_v1, %s1085_s3  ;;  %494 = vrot.lane.b32.xlu0 %v1208_v0, %s1085_s3 }
  0x9b   : > { %500 = vrot.lane.b32.xlu1 %v1214_v3, %s1085_s3  ;;  %498 = vrot.lane.b32.xlu0 %v1212_v2, %s1085_s3 }
  0x9f   : > { %504 = vrot.lane.b32.xlu1 %v1218_v5, %s1085_s3  ;;  %502 = vrot.lane.b32.xlu0 %v1216_v4, %s1085_s3 }
  0xa3   : > { %508 = vrot.lane.b32.xlu1 %v1232_v7, %s1085_s3  ;;  %506 = vrot.lane.b32.xlu0 %v1230_v6, %s1085_s3 }
  0xa7   : > { %545 = vrot.lane.b32.xlu1 %v1210_v1, %s1086_s4  ;;  %543 = vrot.lane.b32.xlu0 %v1208_v0, %s1086_s4 }
  0xa9   : > { %v205_v8 = vpop.permute.xlu1 %204  ;;  %v201_v9 = vpop.permute.xlu0 %200 }
  0xaa   : > { %836 = vst.msk [vmem:[%s1206_s27 + $0x38] sm:$0xff] %vm175_vm0, %v205_v8  ;;  %834 = vst.msk [vmem:[%s1206_s27 + $0x8] sm:$0xff] %vm175_vm0, %v201_v9 }
  0xab   : > { %549 = vrot.lane.b32.xlu1 %v1214_v3, %s1086_s4  ;;  %547 = vrot.lane.b32.xlu0 %v1212_v2, %s1086_s4 }
  0xad   : > { %v207_v10 = vpop.permute.xlu1 %206  ;;  %v203_v11 = vpop.permute.xlu0 %202 }
  0xae   : > { %837 = vst.msk [vmem:[%s1206_s27 + $0x50] sm:$0xff] %vm175_vm0, %v207_v10  ;;  %835 = vst.msk [vmem:[%s1206_s27 + $0x20] sm:$0xff] %vm175_vm0, %v203_v11 }
  0xaf   : > { %553 = vrot.lane.b32.xlu1 %v1218_v5, %s1086_s4  ;;  %551 = vrot.lane.b32.xlu0 %v1216_v4, %s1086_s4 }
  0xb1   : > { %v211_v12 = vpop.permute.xlu1 %210  ;;  %v209_v13 = vpop.permute.xlu0 %208 }
  0xb2   : > { %839 = vst.msk [vmem:[%s1206_s27 + $0x80] sm:$0xff] %vm175_vm0, %v211_v12  ;;  %838 = vst.msk [vmem:[%s1206_s27 + $0x68] sm:$0xff] %vm175_vm0, %v209_v13 }
  0xb3   : > { %557 = vrot.lane.b32.xlu1 %v1232_v7, %s1086_s4  ;;  %555 = vrot.lane.b32.xlu0 %v1230_v6, %s1086_s4 }
  0xb5   : > { %v215_v14 = vpop.permute.xlu1 %214  ;;  %v213_v15 = vpop.permute.xlu0 %212 }
  0xb6   : > { %841 = vst.msk [vmem:[%s1206_s27 + $0xb0] sm:$0xff] %vm175_vm0, %v215_v14  ;;  %840 = vst.msk [vmem:[%s1206_s27 + $0x98] sm:$0xff] %vm175_vm0, %v213_v15 }
  0xb7   : > { %594 = vrot.lane.b32.xlu1 %v1210_v1, %s1087_s5  ;;  %592 = vrot.lane.b32.xlu0 %v1208_v0, %s1087_s5 }
  0xb9   : > { %v252_v16 = vpop.permute.xlu1 %251  ;;  %v250_v17 = vpop.permute.xlu0 %249 }
  0xba   : > { %843 = vst.msk [vmem:[%s1206_s27 + $0x28] sm:$0xff] %vm175_vm0, %v252_v16  ;;  %842 = vst.msk [vmem:[%s1206_s27 + $0x10] sm:$0xff] %vm175_vm0, %v250_v17 }
  0xbb   : > { %598 = vrot.lane.b32.xlu1 %v1214_v3, %s1087_s5  ;;  %596 = vrot.lane.b32.xlu0 %v1212_v2, %s1087_s5 }
  0xbd   : > { %v256_v18 = vpop.permute.xlu1 %255  ;;  %v254_v19 = vpop.permute.xlu0 %253 }
  0xbe   : > { %845 = vst.msk [vmem:[%s1206_s27 + $0x58] sm:$0xff] %vm175_vm0, %v256_v18  ;;  %844 = vst.msk [vmem:[%s1206_s27 + $0x40] sm:$0xff] %vm175_vm0, %v254_v19 }
  0xbf   : > { %602 = vrot.lane.b32.xlu1 %v1218_v5, %s1087_s5  ;;  %600 = vrot.lane.b32.xlu0 %v1216_v4, %s1087_s5 }
  0xc1   : > { %v260_v20 = vpop.permute.xlu1 %259  ;;  %v258_v21 = vpop.permute.xlu0 %257 }
  0xc2   : > { %847 = vst.msk [vmem:[%s1206_s27 + $0x88] sm:$0xff] %vm175_vm0, %v260_v20  ;;  %846 = vst.msk [vmem:[%s1206_s27 + $0x70] sm:$0xff] %vm175_vm0, %v258_v21 }
  0xc3   : > { %606 = vrot.lane.b32.xlu1 %v1232_v7, %s1087_s5  ;;  %604 = vrot.lane.b32.xlu0 %v1230_v6, %s1087_s5 }
  0xc5   : > { %v264_v22 = vpop.permute.xlu1 %263  ;;  %v262_v23 = vpop.permute.xlu0 %261 }
  0xc6   : > { %849 = vst.msk [vmem:[%s1206_s27 + $0xb8] sm:$0xff] %vm175_vm0, %v264_v22  ;;  %848 = vst.msk [vmem:[%s1206_s27 + $0xa0] sm:$0xff] %vm175_vm0, %v262_v23 }
  0xc7   : > { %643 = vrot.lane.b32.xlu1 %v1210_v1, %s1088_s6  ;;  %641 = vrot.lane.b32.xlu0 %v1208_v0, %s1088_s6 }
  0xc9   : > { %v301_v24 = vpop.permute.xlu1 %300  ;;  %v299_v25 = vpop.permute.xlu0 %298 }
  0xca   : > { %851 = vst.msk [vmem:[%s1206_s27 + $0xd8] sm:$0xff] %vm175_vm0, %v301_v24  ;;  %850 = vst.msk [vmem:[%s1206_s27 + $0xc0] sm:$0xff] %vm175_vm0, %v299_v25 }
  0xcb   : > { %647 = vrot.lane.b32.xlu1 %v1214_v3, %s1088_s6  ;;  %645 = vrot.lane.b32.xlu0 %v1212_v2, %s1088_s6 }
  0xcd   : > { %v305_v26 = vpop.permute.xlu1 %304  ;;  %v303_v27 = vpop.permute.xlu0 %302 }
  0xce   : > { %853 = vst.msk [vmem:[%s1206_s27 + $0x108] sm:$0xff] %vm175_vm0, %v305_v26  ;;  %852 = vst.msk [vmem:[%s1206_s27 + $0xf0] sm:$0xff] %vm175_vm0, %v303_v27 }
  0xcf   : > { %651 = vrot.lane.b32.xlu1 %v1218_v5, %s1088_s6  ;;  %649 = vrot.lane.b32.xlu0 %v1216_v4, %s1088_s6 }
  0xd1   : > { %v309_v28 = vpop.permute.xlu1 %308  ;;  %v307_v29 = vpop.permute.xlu0 %306 }
  0xd2   : > { %855 = vst.msk [vmem:[%s1206_s27 + $0x138] sm:$0xff] %vm175_vm0, %v309_v28  ;;  %854 = vst.msk [vmem:[%s1206_s27 + $0x120] sm:$0xff] %vm175_vm0, %v307_v29 }
  0xd3   : > { %655 = vrot.lane.b32.xlu1 %v1232_v7, %s1088_s6  ;;  %653 = vrot.lane.b32.xlu0 %v1230_v6, %s1088_s6 }
  0xd5   : > { %v313_v30 = vpop.permute.xlu1 %312  ;;  %v311_v31 = vpop.permute.xlu0 %310 }
  0xd6   : > { %857 = vst.msk [vmem:[%s1206_s27 + $0x168] sm:$0xff] %vm175_vm0, %v313_v30  ;;  %856 = vst.msk [vmem:[%s1206_s27 + $0x150] sm:$0xff] %vm175_vm0, %v311_v31 }
  0xd7   : > { %692 = vrot.lane.b32.xlu1 %v1210_v1, %s1089_s12  ;;  %690 = vrot.lane.b32.xlu0 %v1208_v0, %s1089_s12 }
  0xd9   : > { %v350_v32 = vpop.permute.xlu1 %349  ;;  %v348_v33 = vpop.permute.xlu0 %347 }
  0xda   : > { %859 = vst.msk [vmem:[%s1206_s27 + $0xe0] sm:$0xff] %vm175_vm0, %v350_v32  ;;  %858 = vst.msk [vmem:[%s1206_s27 + $0xc8] sm:$0xff] %vm175_vm0, %v348_v33 }
  0xdb   : > { %696 = vrot.lane.b32.xlu1 %v1214_v3, %s1089_s12  ;;  %694 = vrot.lane.b32.xlu0 %v1212_v2, %s1089_s12 }
  0xdd   : > { %v354_v34 = vpop.permute.xlu1 %353  ;;  %v352_v35 = vpop.permute.xlu0 %351 }
  0xde   : > { %861 = vst.msk [vmem:[%s1206_s27 + $0x110] sm:$0xff] %vm175_vm0, %v354_v34  ;;  %860 = vst.msk [vmem:[%s1206_s27 + $0xf8] sm:$0xff] %vm175_vm0, %v352_v35 }
  0xdf   : > { %700 = vrot.lane.b32.xlu1 %v1218_v5, %s1089_s12  ;;  %698 = vrot.lane.b32.xlu0 %v1216_v4, %s1089_s12 }
  0xe1   : > { %v358_v36 = vpop.permute.xlu1 %357  ;;  %v356_v37 = vpop.permute.xlu0 %355 }
  0xe2   : > { %863 = vst.msk [vmem:[%s1206_s27 + $0x140] sm:$0xff] %vm175_vm0, %v358_v36  ;;  %862 = vst.msk [vmem:[%s1206_s27 + $0x128] sm:$0xff] %vm175_vm0, %v356_v37 }
  0xe3   : > { %704 = vrot.lane.b32.xlu1 %v1232_v7, %s1089_s12  ;;  %702 = vrot.lane.b32.xlu0 %v1230_v6, %s1089_s12 }
  0xe5   : > { %v362_v38 = vpop.permute.xlu1 %361  ;;  %v360_v39 = vpop.permute.xlu0 %359 }
  0xe6   : > { %865 = vst.msk [vmem:[%s1206_s27 + $0x170] sm:$0xff] %vm175_vm0, %v362_v38  ;;  %864 = vst.msk [vmem:[%s1206_s27 + $0x158] sm:$0xff] %vm175_vm0, %v360_v39 }
  0xe9   : > { %v399_v40 = vpop.permute.xlu1 %398  ;;  %v397_v41 = vpop.permute.xlu0 %396 }
  0xea   : > { %867 = vst.msk [vmem:[%s1206_s27 + $0xe8] sm:$0xff] %vm175_vm0, %v399_v40  ;;  %866 = vst.msk [vmem:[%s1206_s27 + $0xd0] sm:$0xff] %vm175_vm0, %v397_v41 }
  0xed   : > { %v403_v42 = vpop.permute.xlu1 %402  ;;  %v401_v43 = vpop.permute.xlu0 %400 }
  0xee   : > { %869 = vst.msk [vmem:[%s1206_s27 + $0x118] sm:$0xff] %vm175_vm0, %v403_v42  ;;  %868 = vst.msk [vmem:[%s1206_s27 + $0x100] sm:$0xff] %vm175_vm0, %v401_v43 }
  0xf1   : > { %v407_v44 = vpop.permute.xlu1 %406  ;;  %v405_v45 = vpop.permute.xlu0 %404 }
  0xf2   : > { %871 = vst.msk [vmem:[%s1206_s27 + $0x148] sm:$0xff] %vm175_vm0, %v407_v44  ;;  %870 = vst.msk [vmem:[%s1206_s27 + $0x130] sm:$0xff] %vm175_vm0, %v405_v45 }
  0xf5   : > { %v411_v46 = vpop.permute.xlu1 %410  ;;  %v409_v47 = vpop.permute.xlu0 %408 }
  0xf6   : > { %873 = vst.msk [vmem:[%s1206_s27 + $0x178] sm:$0xff] %vm175_vm0, %v411_v46  ;;  %872 = vst.msk [vmem:[%s1206_s27 + $0x160] sm:$0xff] %vm175_vm0, %v409_v47 }
  0xf9   : > { %v448_v48 = vpop.permute.xlu1 %447  ;;  %v446_v49 = vpop.permute.xlu0 %445 }
  0xfa   : > { %875 = vst.msk [vmem:[%s1206_s27 + $0x198] sm:$0xff] %vm175_vm0, %v448_v48  ;;  %874 = vst.msk [vmem:[%s1206_s27 + $0x180] sm:$0xff] %vm175_vm0, %v446_v49 }
  0xfd   : > { %v452_v50 = vpop.permute.xlu1 %451  ;;  %v450_v51 = vpop.permute.xlu0 %449 }
  0xfe   : > { %877 = vst.msk [vmem:[%s1206_s27 + $0x1c8] sm:$0xff] %vm175_vm0, %v452_v50  ;;  %876 = vst.msk [vmem:[%s1206_s27 + $0x1b0] sm:$0xff] %vm175_vm0, %v450_v51 }
 0x101   : > { %v456_v52 = vpop.permute.xlu1 %455  ;;  %v454_v53 = vpop.permute.xlu0 %453 }
 0x102   : > { %879 = vst.msk [vmem:[%s1206_s27 + $0x1f8] sm:$0xff] %vm175_vm0, %v456_v52  ;;  %878 = vst.msk [vmem:[%s1206_s27 + $0x1e0] sm:$0xff] %vm175_vm0, %v454_v53 }
 0x105   : > { %v460_v54 = vpop.permute.xlu1 %459  ;;  %v458_v55 = vpop.permute.xlu0 %457 }
 0x106   : > { %881 = vst.msk [vmem:[%s1206_s27 + $0x228] sm:$0xff] %vm175_vm0, %v460_v54  ;;  %880 = vst.msk [vmem:[%s1206_s27 + $0x210] sm:$0xff] %vm175_vm0, %v458_v55 }
 0x109   : > { %v497_v56 = vpop.permute.xlu1 %496  ;;  %v495_v57 = vpop.permute.xlu0 %494 }
 0x10a   : > { %883 = vst.msk [vmem:[%s1206_s27 + $0x1a0] sm:$0xff] %vm175_vm0, %v497_v56  ;;  %882 = vst.msk [vmem:[%s1206_s27 + $0x188] sm:$0xff] %vm175_vm0, %v495_v57 }
 0x10d   : > { %v501_v58 = vpop.permute.xlu1 %500  ;;  %v499_v59 = vpop.permute.xlu0 %498 }
 0x10e   : > { %885 = vst.msk [vmem:[%s1206_s27 + $0x1d0] sm:$0xff] %vm175_vm0, %v501_v58  ;;  %884 = vst.msk [vmem:[%s1206_s27 + $0x1b8] sm:$0xff] %vm175_vm0, %v499_v59 }
 0x111   : > { %v505_v60 = vpop.permute.xlu1 %504  ;;  %v503_v61 = vpop.permute.xlu0 %502 }
 0x112   : > { %887 = vst.msk [vmem:[%s1206_s27 + $0x200] sm:$0xff] %vm175_vm0, %v505_v60  ;;  %886 = vst.msk [vmem:[%s1206_s27 + $0x1e8] sm:$0xff] %vm175_vm0, %v503_v61 }
 0x115   : > { %v509_v62 = vpop.permute.xlu1 %508  ;;  %v507_v63 = vpop.permute.xlu0 %506 }
 0x116   : > { %889 = vst.msk [vmem:[%s1206_s27 + $0x230] sm:$0xff] %vm175_vm0, %v509_v62  ;;  %888 = vst.msk [vmem:[%s1206_s27 + $0x218] sm:$0xff] %vm175_vm0, %v507_v63 }
 0x119   : > { %v546_v0 = vpop.permute.xlu1 %545  ;;  %v544_v1 = vpop.permute.xlu0 %543 }
 0x11a   : > { %891 = vst.msk [vmem:[%s1206_s27 + $0x1a8] sm:$0xff] %vm175_vm0, %v546_v0  ;;  %890 = vst.msk [vmem:[%s1206_s27 + $0x190] sm:$0xff] %vm175_vm0, %v544_v1 }
 0x11d   : > { %v550_v2 = vpop.permute.xlu1 %549  ;;  %v548_v3 = vpop.permute.xlu0 %547 }
 0x11e   : > { %893 = vst.msk [vmem:[%s1206_s27 + $0x1d8] sm:$0xff] %vm175_vm0, %v550_v2  ;;  %892 = vst.msk [vmem:[%s1206_s27 + $0x1c0] sm:$0xff] %vm175_vm0, %v548_v3 }
 0x121   : > { %v554_v4 = vpop.permute.xlu1 %553  ;;  %v552_v5 = vpop.permute.xlu0 %551 }
 0x122   : > { %895 = vst.msk [vmem:[%s1206_s27 + $0x208] sm:$0xff] %vm175_vm0, %v554_v4  ;;  %894 = vst.msk [vmem:[%s1206_s27 + $0x1f0] sm:$0xff] %vm175_vm0, %v552_v5 }
 0x125   : > { %v558_v6 = vpop.permute.xlu1 %557  ;;  %v556_v7 = vpop.permute.xlu0 %555 }
 0x126   : > { %897 = vst.msk [vmem:[%s1206_s27 + $0x238] sm:$0xff] %vm175_vm0, %v558_v6  ;;  %896 = vst.msk [vmem:[%s1206_s27 + $0x220] sm:$0xff] %vm175_vm0, %v556_v7 }
 0x129   : > { %v595_v8 = vpop.permute.xlu1 %594  ;;  %v593_v9 = vpop.permute.xlu0 %592 }
 0x12a   : > { %899 = vst.msk [vmem:[%s1206_s27 + $0x258] sm:$0xff] %vm175_vm0, %v595_v8  ;;  %898 = vst.msk [vmem:[%s1206_s27 + $0x240] sm:$0xff] %vm175_vm0, %v593_v9 }
 0x12d   : > { %v599_v10 = vpop.permute.xlu1 %598  ;;  %v597_v11 = vpop.permute.xlu0 %596 }
 0x12e   : > { %901 = vst.msk [vmem:[%s1206_s27 + $0x288] sm:$0xff] %vm175_vm0, %v599_v10  ;;  %900 = vst.msk [vmem:[%s1206_s27 + $0x270] sm:$0xff] %vm175_vm0, %v597_v11 }
 0x131   : > { %v603_v12 = vpop.permute.xlu1 %602  ;;  %v601_v13 = vpop.permute.xlu0 %600 }
 0x132   : > { %903 = vst.msk [vmem:[%s1206_s27 + $0x2b8] sm:$0xff] %vm175_vm0, %v603_v12  ;;  %902 = vst.msk [vmem:[%s1206_s27 + $0x2a0] sm:$0xff] %vm175_vm0, %v601_v13 }
 0x135   : > { %v607_v14 = vpop.permute.xlu1 %606  ;;  %v605_v15 = vpop.permute.xlu0 %604 }
 0x136   : > { %905 = vst.msk [vmem:[%s1206_s27 + $0x2e8] sm:$0xff] %vm175_vm0, %v607_v14  ;;  %904 = vst.msk [vmem:[%s1206_s27 + $0x2d0] sm:$0xff] %vm175_vm0, %v605_v15 }
 0x139   : > { %v644_v16 = vpop.permute.xlu1 %643  ;;  %v642_v17 = vpop.permute.xlu0 %641 }
 0x13a   : > { %907 = vst.msk [vmem:[%s1206_s27 + $0x260] sm:$0xff] %vm175_vm0, %v644_v16  ;;  %906 = vst.msk [vmem:[%s1206_s27 + $0x248] sm:$0xff] %vm175_vm0, %v642_v17 }
 0x13d   : > { %v648_v18 = vpop.permute.xlu1 %647  ;;  %v646_v19 = vpop.permute.xlu0 %645 }
 0x13e   : > { %909 = vst.msk [vmem:[%s1206_s27 + $0x290] sm:$0xff] %vm175_vm0, %v648_v18  ;;  %908 = vst.msk [vmem:[%s1206_s27 + $0x278] sm:$0xff] %vm175_vm0, %v646_v19 }
 0x141   : > { %v652_v20 = vpop.permute.xlu1 %651  ;;  %v650_v21 = vpop.permute.xlu0 %649 }
 0x142   : > { %911 = vst.msk [vmem:[%s1206_s27 + $0x2c0] sm:$0xff] %vm175_vm0, %v652_v20  ;;  %910 = vst.msk [vmem:[%s1206_s27 + $0x2a8] sm:$0xff] %vm175_vm0, %v650_v21 }
 0x145   : > { %v656_v22 = vpop.permute.xlu1 %655  ;;  %v654_v23 = vpop.permute.xlu0 %653 }
 0x146   : > { %913 = vst.msk [vmem:[%s1206_s27 + $0x2f0] sm:$0xff] %vm175_vm0, %v656_v22  ;;  %912 = vst.msk [vmem:[%s1206_s27 + $0x2d8] sm:$0xff] %vm175_vm0, %v654_v23 }
 0x149   : > { %v693_v24 = vpop.permute.xlu1 %692  ;;  %v691_v25 = vpop.permute.xlu0 %690 }
 0x14a   : > { %915 = vst.msk [vmem:[%s1206_s27 + $0x268] sm:$0xff] %vm175_vm0, %v693_v24  ;;  %914 = vst.msk [vmem:[%s1206_s27 + $0x250] sm:$0xff] %vm175_vm0, %v691_v25 }
 0x14d   : > { %v697_v26 = vpop.permute.xlu1 %696  ;;  %v695_v27 = vpop.permute.xlu0 %694 }
 0x14e   : > { %917 = vst.msk [vmem:[%s1206_s27 + $0x298] sm:$0xff] %vm175_vm0, %v697_v26  ;;  %916 = vst.msk [vmem:[%s1206_s27 + $0x280] sm:$0xff] %vm175_vm0, %v695_v27 }
 0x151   : > { %v701_v28 = vpop.permute.xlu1 %700  ;;  %v699_v29 = vpop.permute.xlu0 %698 }
 0x152   : > { %919 = vst.msk [vmem:[%s1206_s27 + $0x2c8] sm:$0xff] %vm175_vm0, %v701_v28  ;;  %918 = vst.msk [vmem:[%s1206_s27 + $0x2b0] sm:$0xff] %vm175_vm0, %v699_v29 }
 0x155   : > { %v705_v30 = vpop.permute.xlu1 %704  ;;  %v703_v31 = vpop.permute.xlu0 %702 }
 0x156   : > { %921 = vst.msk [vmem:[%s1206_s27 + $0x2f8] sm:$0xff] %vm175_vm0, %v705_v30  ;;  %920 = vst.msk [vmem:[%s1206_s27 + $0x2e0] sm:$0xff] %vm175_vm0, %v703_v31 }
 0x157 PF: > { %s14_s11 = sadd.s32 1, %s1074_s11   ;;  %s1535_s6 = smov %s1058_s7 }
 0x158   : > { %p11_p7 = scmp.ge.s32.totalorder %s14_s11, 4   ;;  %s1536_s7 = smov %s1062_s8 }
 0x159   : > { %s1537_s8 = smov %s1149_s18  ;;  %s1538_s9 = smov %s1070_s10 }
 0x15a   : > { %s1539_s10 = smov %s1541_s13  ;;  %13 = sbr.rel (!%p11_p7) target bundleno = 4 (0x4), region = 75 }
 0x161   :  { %755 = vsyncpa [#allocation3], 1 }
 0x162   :  { %757 = vsyncpa [#allocation3 + $0x1], 1 }

</bundles_post_ra>
